<compile_context>
chip_gen: v6e
topology: v6e:2x2x1
jax: 0.10.0
libtpu: 0.0.40
codegen_flags: <defaults>
</compile_context>

<pallas_src>
import functools

import jax
import jax.numpy as jnp
from jax.experimental import pallas as pl
from jax.experimental.pallas import tpu as pltpu

F_IN = 5
F_OUT_M = 3
F_OUT_R = 1
F_OUT = F_OUT_M + F_OUT_R  # fused weight width = 4

DEFAULT_TB = 4096            # batch tile; ~1.5 KiB/row lane-padded, x3 streams
SMALL_BATCH_FALLBACK = 1024  # below this, plain XLA beats pallas_call overhead
_MIN_GRID_STEPS = 4          # keep both v7x TensorCores busy + pipeline overlap


def _round_up(x, m):
    return ((x + m - 1) // m) * m


def _choose_tb(batch, tb_max):
    """Batch tile: multiple of 8 (sublane rule), capped at tb_max so the
    double-buffered VMEM blocks fit, shrunk so large batches get at least
    _MIN_GRID_STEPS grid steps (v7x megacore sharding + DMA/compute overlap)."""
    tb = max(8, min(tb_max, _round_up(batch, 8)))
    if batch >= _MIN_GRID_STEPS * 512:
        tb = min(tb, _round_up(pl.cdiv(batch, _MIN_GRID_STEPS), 8))
    return tb


def _regression_kernel(x_ref, w_ref, b_ref, m_ref, r_ref):
    # One batch tile per grid step; the tiny fused (5, 4) weight and (1, 4)
    # bias stay VMEM-resident (constant index_map).
    x = x_ref[...]                                             # (tb, 5) f32
    y = jnp.dot(x, w_ref[...], preferred_element_type=jnp.float32)
    y = y + b_ref[...]                                         # broadcast (1, 4)
    m_ref[...] = y[:, :F_OUT_M]                                # (tb, 3)
    r_ref[...] = y[:, F_OUT_M:]                                # (tb, 1)


def _forward_pallas(x, w, b, tb):
    batch = x.shape[0]
    grid = (pl.cdiv(batch, tb),)   # ragged last block is masked by Pallas
    return pl.pallas_call(
        _regression_kernel,
        out_shape=(
            jax.ShapeDtypeStruct((batch, F_OUT_M), jnp.float32),
            jax.ShapeDtypeStruct((batch, F_OUT_R), jnp.float32),
        ),
        grid=grid,
        in_specs=[
            pl.BlockSpec((tb, F_IN), lambda i: (i, 0)),       # streamed x tile
            pl.BlockSpec((F_IN, F_OUT), lambda i: (0, 0)),    # resident weight
            pl.BlockSpec((1, F_OUT), lambda i: (0, 0)),       # resident bias
        ],
        out_specs=(
            pl.BlockSpec((tb, F_OUT_M), lambda i: (i, 0)),    # m stream
            pl.BlockSpec((tb, F_OUT_R), lambda i: (i, 0)),    # r stream
        ),
        compiler_params=pltpu.CompilerParams(
            dimension_semantics=("parallel",),
            vmem_limit_bytes=32 * 1024 * 1024,
        ),
        cost_estimate=pl.CostEstimate(
            flops=2 * batch * F_IN * F_OUT,
            transcendentals=0,
            bytes_accessed=batch * (F_IN + F_OUT) * 4,
        ),
    )(x, w, b)


@functools.partial(jax.jit, static_argnames=("tb", "force_pallas"))
def regression_forward(x, w_m, b_m, w_r, b_r, *, tb=DEFAULT_TB, force_pallas=False):
    """x: (B, 5) f32; w_m: (5, 3); b_m: (3,); w_r: (5, 1); b_r: (1,).

    Returns (m, r) with shapes (B, 3) and (B, 1), matching the PyTorch module.
    """
    x = x.astype(jnp.float32)
    batch = x.shape[0]

    if batch < SMALL_BATCH_FALLBACK and not force_pallas:
        # Small-batch fast path: the fixed pallas_call launch overhead dwarfs
        # the ~36 B/row of useful traffic; a fused XLA matmul is strictly faster.
        m = jnp.dot(x, w_m.astype(jnp.float32)) + b_m
        r = jnp.dot(x, w_r.astype(jnp.float32)) + b_r
        return m, r

    # Fuse both heads into a single resident (5, 4) weight / (1, 4) bias so the
    # kernel does one MXU push per batch tile; the kernel splits the columns
    # itself so no post-kernel slicing pass over the outputs is needed.
    w = jnp.concatenate([w_m, w_r], axis=1).astype(jnp.float32)            # (5, 4)
    b = jnp.concatenate([b_m, b_r], axis=0).reshape(1, F_OUT).astype(jnp.float32)

    tb_eff = _choose_tb(batch, tb)
    return _forward_pallas(x, w, b, tb_eff)


def init_params(key):
    """Deterministic init mimicking nn.Linear: U(-1/sqrt(fan_in), 1/sqrt(fan_in))."""
    k1, k2, k3, k4 = jax.random.split(key, 4)
    bound = 1.0 / jnp.sqrt(jnp.float32(F_IN))
    # Stored as (in, out) so the kernel does x @ W (equivalent to x @ W_pt.T).
    w_m = jax.random.uniform(k1, (F_IN, F_OUT_M), jnp.float32, -bound, bound)
    b_m = jax.random.uniform(k2, (F_OUT_M,), jnp.float32, -bound, bound)
    w_r = jax.random.uniform(k3, (F_IN, F_OUT_R), jnp.float32, -bound, bound)
    b_r = jax.random.uniform(k4, (F_OUT_R,), jnp.float32, -bound, bound)
    return w_m, b_m, w_r, b_r


if __name__ == "__main__":
    key = jax.random.PRNGKey(0)
    kx, kx2, kp = jax.random.split(key, 3)

    w_m, b_m, w_r, b_r = init_params(kp)

    # Small shape consistent with the module (batch=8, features=5); force the
    # Pallas path so the kernel itself is exercised at this shape.
    B = 8
    x = jax.random.normal(kx, (B, F_IN), jnp.float32)
    m, r = regression_forward(x, w_m, b_m, w_r, b_r, force_pallas=True)
    jax.block_until_ready((m, r))

    m_ref = x @ w_m + b_m
    r_ref = x @ w_r + b_r
    assert m.shape == (B, F_OUT_M) and r.shape == (B, F_OUT_R)
    assert jnp.allclose(m, m_ref, atol=1e-5, rtol=1e-5)
    assert jnp.allclose(r, r_ref, atol=1e-5, rtol=1e-5)

    # Larger, non-tile-aligned batch: exercises the multi-step grid with a
    # ragged last block (no padding pass) and the >=4-grid-step tb heuristic.
    B2 = 5003
    x2 = jax.random.normal(kx2, (B2, F_IN), jnp.float32)
    m2, r2 = regression_forward(x2, w_m, b_m, w_r, b_r)
    jax.block_until_ready((m2, r2))

    m2_ref = x2 @ w_m + b_m
    r2_ref = x2 @ w_r + b_r
    assert m2.shape == (B2, F_OUT_M) and r2.shape == (B2, F_OUT_R)
    assert jnp.allclose(m2, m2_ref, atol=1e-5, rtol=1e-5)
    assert jnp.allclose(r2, r2_ref, atol=1e-5, rtol=1e-5)

    # Small-batch dispatch path (plain XLA fast path) stays consistent.
    m3, r3 = regression_forward(x, w_m, b_m, w_r, b_r)
    jax.block_until_ready((m3, r3))
    assert jnp.allclose(m3, m_ref, atol=1e-5, rtol=1e-5)
    assert jnp.allclose(r3, r_ref, atol=1e-5, rtol=1e-5)

    print("KERNEL_OK")
</pallas_src>

<mosaic_0001>
module attributes {stable_mosaic.version = 11 : i64} {
  func.func @_regression_kernel(%arg0: i32, %arg1: memref<8x5xf32, #tpu.memory_space<vmem>>, %arg2: memref<5x4xf32, #tpu.memory_space<vmem>>, %arg3: memref<1x4xf32, #tpu.memory_space<vmem>>, %arg4: memref<8x3xf32, #tpu.memory_space<vmem>>, %arg5: memref<8x1xf32, #tpu.memory_space<vmem>>) attributes {dimension_semantics = [#tpu.dimension_semantics<parallel>], iteration_bounds = array<i64: 1>, scalar_prefetch = 0 : i64, scratch_operands = 0 : i64, tpu.core_type = #tpu.core_type<tc>, window_params = [{transform_indices = @transform_0, window_bounds = array<i64: 8, 5>}, {pipeline_mode = #tpu.pipeline_mode<synchronous>, transform_indices = @transform_1, window_bounds = array<i64: 5, 4>}, {pipeline_mode = #tpu.pipeline_mode<synchronous>, transform_indices = @transform_2, window_bounds = array<i64: 1, 4>}, {transform_indices = @transform_3, window_bounds = array<i64: 8, 3>}, {transform_indices = @transform_4, window_bounds = array<i64: 8, 1>}]} {
    %c0 = arith.constant 0 : index
    %c0_0 = arith.constant 0 : index
    %0 = vector.load %arg1[%c0, %c0_0] : memref<8x5xf32, #tpu.memory_space<vmem>>, vector<8x5xf32>
    %c0_1 = arith.constant 0 : index
    %c0_2 = arith.constant 0 : index
    %1 = vector.load %arg2[%c0_1, %c0_2] : memref<5x4xf32, #tpu.memory_space<vmem>>, vector<5x4xf32>
    %cst = arith.constant dense<0.000000e+00> : vector<8x4xf32>
    %2 = tpu.matmul %0, %1, %cst {dimension_numbers = #tpu.dot_dimension_numbers<[1], [0], [0], [1], [0, 0, 1, 1], [], []>} : vector<8x5xf32>, vector<5x4xf32>, vector<8x4xf32> -> vector<8x4xf32>
    %c0_3 = arith.constant 0 : index
    %c0_4 = arith.constant 0 : index
    %3 = vector.load %arg3[%c0_3, %c0_4] : memref<1x4xf32, #tpu.memory_space<vmem>>, vector<1x4xf32>
    %4 = vector.broadcast %3 : vector<1x4xf32> to vector<8x4xf32>
    %5 = arith.addf %2, %4 : vector<8x4xf32>
    %6 = vector.extract_strided_slice %5 {offsets = [0, 0], sizes = [8, 3], strides = [1, 1]} : vector<8x4xf32> to vector<8x3xf32>
    %c0_5 = arith.constant 0 : index
    %c0_6 = arith.constant 0 : index
    %7 = vector.load %arg4[%c0_5, %c0_6] : memref<8x3xf32, #tpu.memory_space<vmem>>, vector<8x3xf32>
    tpu.vector_store %arg4[%c0_5, %c0_6], %6 {strides = array<i32>} : memref<8x3xf32, #tpu.memory_space<vmem>>, vector<8x3xf32>,
    %8 = vector.extract_strided_slice %5 {offsets = [0, 3], sizes = [8, 1], strides = [1, 1]} : vector<8x4xf32> to vector<8x1xf32>
    %c0_7 = arith.constant 0 : index
    %c0_8 = arith.constant 0 : index
    %9 = vector.load %arg5[%c0_7, %c0_8] : memref<8x1xf32, #tpu.memory_space<vmem>>, vector<8x1xf32>
    tpu.vector_store %arg5[%c0_7, %c0_8], %8 {strides = array<i32>} : memref<8x1xf32, #tpu.memory_space<vmem>>, vector<8x1xf32>,
    return
  }
  func.func @transform_0(%arg0: i32) -> (i32, i32) {
    %c0_i32 = arith.constant 0 : i32
    %c0_i32_0 = arith.constant 0 : i32
    return %arg0, %c0_i32 : i32, i32
  }
  func.func @transform_1(%arg0: i32) -> (i32, i32) {
    %c0_i32 = arith.constant 0 : i32
    %c0_i32_0 = arith.constant 0 : i32
    %c0_i32_1 = arith.constant 0 : i32
    return %c0_i32, %c0_i32_0 : i32, i32
  }
  func.func @transform_2(%arg0: i32) -> (i32, i32) {
    %c0_i32 = arith.constant 0 : i32
    %c0_i32_0 = arith.constant 0 : i32
    %c0_i32_1 = arith.constant 0 : i32
    return %c0_i32, %c0_i32_0 : i32, i32
  }
  func.func @transform_3(%arg0: i32) -> (i32, i32) {
    %c0_i32 = arith.constant 0 : i32
    %c0_i32_0 = arith.constant 0 : i32
    return %arg0, %c0_i32 : i32, i32
  }
  func.func @transform_4(%arg0: i32) -> (i32, i32) {
    %c0_i32 = arith.constant 0 : i32
    %c0_i32_0 = arith.constant 0 : i32
    return %arg0, %c0_i32 : i32, i32
  }
}

</mosaic_0001>

<bundles_post_ra>
// kernel: regression_forward.1
= control target key start
LH: loop header
LB: loop body
LE: loop exit
PB: predicated region body
PF: predicated region fallthrough
CT: control target
= control target key end

     0   :  { %vm29_vm0 = vcmask 1044480   ;;  %vm25_vm1 = vcmask 39936   ;;  %v132_v0 = vmov 0.0   ;;  %vm133_vm2 = vmmov 0   ;;  %s175_s1 = inlined_call_operand.vmem [shape: f32[5,4], index: 1, kind: input, shape index: {}]   ;;  %s176_s0 = inlined_call_operand.vmem [shape: f32[8,5], index: 0, kind: input, shape index: {}]   ;;  %s177_s2 = inlined_call_operand.vmem [shape: f32[1,4], index: 2, kind: input, shape index: {}]   ;;  %s178_s3 = inlined_call_operand.vmem [shape: f32[8,3], index: 3, kind: output, shape index: {0}]   ;;  %s179_s4 = inlined_call_operand.vmem [shape: f32[8,1], index: 4, kind: output, shape index: {1}]  }
   0x1   :  { %124 = vmatprep.subr.mxu0 %v132_v0  ;;  %v17_v1 = vld [vmem:[%s175_s1] sm:$0x1f]  ;;  %126 = vmatprep.mubr.msk.f32.mxu0 %vm133_vm2, %v132_v0  ;;  %vm103_vm3 = vcmask 23552   ;;  %s134_s1 = smov 125   ;;  %vm109_vm4 = vcmask 7168  }
   0x2   :  { %v16_v2 = vld [vmem:[%s176_s0] sm:$0xff]  ;;  %125 = vmatpush3.msk.msra.mxu0 %vm29_vm0, %v17_v1 }
   0x3   :  { %127 = vmatmul.mubr.msk.f32.vlgmr.msra.gmra.mxu0 %vm25_vm1, %v16_v2  ;;  %v119_v3 = vld [vmem:[%s177_s2] ss:$0 sm:$0xff] }
  0xc3   :  { %v99_v4 = vpop.f32.mrf.mxu0 }
  0xc4   :  { %v100_v5 = vadd.f32 %v119_v3, %v99_v4 }
  0xc5   :  { %v128_v6 = vpop.f32.mrf.mxu0 }
  0xc6   :  { %104 = vst.msk [vmem:[%s178_s3] sm:$0xff] %vm103_vm3, %v100_v5  ;;  %106 = vrot.lane.b32.xlu0 %v100_v5, %s134_s1 }
 0x138   :  { %v107_v7 = vpop.permute.xlu0 %106 }
 0x139   :  { %110 = vst.msk [vmem:[%s179_s4] sm:$0xff] %vm109_vm4, %v107_v7 }

</bundles_post_ra>
